<compile_context>
chip_gen: v7x
topology: tpu7x:2x2x1
jax: 0.10.0
libtpu: 0.0.40
codegen_flags: <defaults>
</compile_context>

<pallas_src>
from functools import partial

import jax
import jax.numpy as jnp
import numpy as np
from jax import lax
from jax.experimental import pallas as pl
from jax.experimental.pallas import tpu as pltpu

_CHUNK = 512            # time steps processed per inner-loop step
_KEEP_BIT = 1 << 15     # bit 15 of the packed output = "emit this step"
_IDX_MASK = _KEEP_BIT - 1


def _round_up(x: int, m: int) -> int:
    return ((x + m - 1) // m) * m


def _greedy_ctc_kernel(ign_ref, em_ref, out_ref):
    """One natural-layout (TILE_T, L) emission tile -> one packed (1, TILE_T) row.

    ign_ref : SMEM (K,)        int32  -- ignore label ids (scalar prefetch)
    em_ref  : VMEM (TILE_T, L)        -- emission tile, time on sublanes
    out_ref : VMEM (1, TILE_T) int32  -- bit 15 = keep, low 15 bits = argmax idx
    """
    tile_t, num_labels = em_ref.shape
    chunk = min(_CHUNK, tile_t)
    if tile_t % chunk:            # never happens with the wrapper's tile selection
        chunk = tile_t
    n_chunks = tile_t // chunk

    # Hoisted constants (JAX does not CSE broadcast_in_dim inside the loop).
    lane_f = lax.broadcasted_iota(jnp.int32, (chunk, num_labels), 1).astype(jnp.float32)
    # 8 identical weight rows keep the MXU lhs at its native sublane count.
    widx = lax.broadcasted_iota(jnp.int32, (8, num_labels), 1).astype(jnp.float32)
    pos = lax.broadcasted_iota(jnp.int32, (1, chunk), 1)

    def body(c, prev_idx):        # prev_idx: (1, 1) int32, last idx of previous chunk
        r0 = c * chunk
        if chunk % 128 == 0:
            r0 = pl.multiple_of(r0, 128)
        em = em_ref[pl.ds(r0, chunk), :]                           # (chunk, L)

        # torch.argmax semantics: first maximal label per time step.
        m = jnp.max(em, axis=1, keepdims=True)                     # (chunk, 1)
        idx_col = jnp.min(jnp.where(em == m, lane_f, jnp.float32(num_labels)),
                          axis=1, keepdims=True)                   # (chunk, 1) exact ints
        onehot = (lane_f == idx_col).astype(jnp.float32)           # (chunk, L) exact one-hot

        # Relayout (chunk, 1) -> lane-dense (1, chunk): contract the one-hot against
        # the label-index row on the MXU (exact: 0/1 entries, integer weights < 256).
        idx8 = lax.dot_general(widx, onehot, (((1,), (1,)), ((), ())),
                               preferred_element_type=jnp.float32)  # (8, chunk)
        idx = idx8[0:1, :].astype(jnp.int32)                        # (1, chunk)

        # unique_consecutive: keep a step iff its label differs from the previous one.
        rolled = pltpu.roll(idx, shift=1, axis=1)
        prev = jnp.where(pos == 0, prev_idx, rolled)
        changed = idx != prev

        # ignore set: K is small & static -> unrolled scalar compares from SMEM.
        is_ignored = jnp.zeros(idx.shape, dtype=jnp.bool_)
        for k in range(ign_ref.shape[0]):
            is_ignored = jnp.logical_or(is_ignored, idx == ign_ref[k])
        keep = jnp.logical_and(changed, jnp.logical_not(is_ignored)).astype(jnp.int32)

        out_ref[0:1, pl.ds(r0, chunk)] = (keep << 15) | idx
        return idx[0:1, chunk - 1:chunk]                            # carry last idx

    # -1 sentinel: the tile's first step is treated as "changed"; any mistake at a
    # tile boundary is repaired by the O(grid) fix-up in the wrapper.
    lax.fori_loop(0, n_chunks, body, jnp.full((1, 1), -1, dtype=jnp.int32))


@partial(jax.jit, static_argnames=("tile_t",))
def greedy_ctc_decode_packed(emission: jax.Array, ignore_ids: jax.Array, *,
                             tile_t: int = 16384):
    """emission: (T, L) logits (any float dtype); ignore_ids: (K,) int32.

    Returns a (T,) int32 array: bit 15 = keep (emit this step), low bits = argmax
    label index.  Equivalent to argmax -> unique_consecutive -> ignore filtering.
    """
    T, L = emission.shape
    assert L <= 256 and L <= _IDX_MASK, "label ids must fit the exact MXU relayout / packing"

    # Tile selection.  Natural-layout (tile, L) blocks are lane-padded to 128 in VMEM
    # (~512 B per f32 row), so the 16K-row default costs ~8 MiB per buffer: big enough
    # to amortize the per-grid-step overhead on v5e/v6e/v7x while double-buffering
    # comfortably inside v7x's 64 MiB VMEM.
    if T <= _CHUNK and T <= tile_t:
        tt = T                                      # whole (small) input as one block
    else:
        tt = max(128, min(tile_t, _round_up(T, 128)))
        tt = _round_up(tt, 128)
        if tt > _CHUNK:
            tt = _round_up(tt, _CHUNK)
    grid_t = pl.cdiv(T, tt)
    t_out = grid_t * tt          # only the (tiny int32) output is padded; the emission
                                 # itself is never copied, transposed or padded.

    row_bytes = _round_up(L, 128) * emission.dtype.itemsize        # lane-padded VMEM row
    vmem_bytes = int(min(96 * 2**20,
                         max(32 * 2**20,
                             2 * tt * row_bytes + 2 * 8 * tt * 4 + 8 * 2**20)))

    packed = pl.pallas_call(
        _greedy_ctc_kernel,
        out_shape=jax.ShapeDtypeStruct((1, t_out), jnp.int32),
        grid_spec=pltpu.PrefetchScalarGridSpec(
            num_scalar_prefetch=1,                                  # ignore_ids -> SMEM
            grid=(grid_t,),
            in_specs=[pl.BlockSpec((tt, L), lambda t, ign: (t, 0))],
            out_specs=pl.BlockSpec((1, tt), lambda t, ign: (0, t)),
        ),
        compiler_params=pltpu.CompilerParams(
            dimension_semantics=("parallel",),       # no cross-tile state in-kernel
            vmem_limit_bytes=vmem_bytes,
        ),
    )(ignore_ids, emission)

    row = packed[0]

    # Cross-tile unique_consecutive fix-up: the kernel treats each tile's first step
    # as "changed"; clear its keep bit when it actually repeats the label of the last
    # step of the previous tile.  O(grid_t) work.
    if grid_t > 1:
        b = jnp.arange(1, grid_t, dtype=jnp.int32) * tt
        cur = row[b]
        prev = row[b - 1]
        same = (cur & _IDX_MASK) == (prev & _IDX_MASK)
        row = row.at[b].set(jnp.where(same, cur & _IDX_MASK, cur))

    return row[:T]


def _decode_packed(packed_np: np.ndarray, labels) -> str:
    return ''.join(labels[int(v) & _IDX_MASK] for v in packed_np if int(v) & _KEEP_BIT)


class GreedyCTCDecoder:
    """JAX/Pallas port of the torchaudio GreedyCTCDecoder forward pass."""

    def __init__(self, labels, ignore):
        self.labels = labels
        self.ignore = list(ignore)
        ids = self.ignore if self.ignore else [-1]   # -1 never matches a label id
        self._ignore_ids = jnp.asarray(ids, dtype=jnp.int32)

    def __call__(self, emission: jax.Array) -> str:
        packed = greedy_ctc_decode_packed(emission, self._ignore_ids)
        packed_np = np.asarray(jax.device_get(jax.block_until_ready(packed)))
        # TODO(synk): transcript string assembly (Python str) has no array form; host-side glue.
        return _decode_packed(packed_np, self.labels)


def _reference_decode(em_np: np.ndarray, labels, ignore) -> str:
    ref_idx = em_np.argmax(axis=-1)
    uniq = []
    for i in ref_idx:
        if not uniq or uniq[-1] != int(i):
            uniq.append(int(i))
    return ''.join(labels[i] for i in uniq if i not in ignore)


if __name__ == "__main__":
    # 32 labels; label 0 ("-") is the CTC blank and is ignored.
    labels = ["-"] + list("abcdefghijklmnopqrstuvwxyz") + ["'", " ", ".", ",", "?"]
    assert len(labels) == 32
    decoder = GreedyCTCDecoder(labels, ignore=[0])

    key = jax.random.PRNGKey(0)

    # Small case matching the module spec: emission [num_seq=8, num_label=32].
    num_seq, num_label = 8, 32
    emission = jax.random.normal(key, (num_seq, num_label), dtype=jnp.float32)
    transcript = decoder(emission)
    ref = _reference_decode(np.asarray(emission), labels, decoder.ignore)
    assert transcript == ref, (transcript, ref)

    # Longer case with label runs forced across tile / chunk boundaries (exercises
    # the in-kernel chunk carry and the O(grid) cross-tile fix-up).
    key2 = jax.random.PRNGKey(1)
    em_long = jax.random.normal(key2, (1000, num_label), dtype=jnp.float32)
    em_long = em_long.at[120:140, 3].set(50.0)     # repeated label spanning t=128
    em_long = em_long.at[250:262, 0].set(50.0)     # ignored blank run spanning t=256
    em_long = em_long.at[505:520, 7].set(50.0)     # repeated label spanning t=512
    ref_long = _reference_decode(np.asarray(em_long), labels, decoder.ignore)
    for tt in (128, 512, 1024):
        out = greedy_ctc_decode_packed(em_long, decoder._ignore_ids, tile_t=tt)
        out = np.asarray(jax.device_get(jax.block_until_ready(out)))
        got = _decode_packed(out, labels)
        assert got == ref_long, (tt, got[:80], ref_long[:80])

    # Larger random case: ragged single big tile (default) and a multi-tile split.
    key3 = jax.random.PRNGKey(2)
    em_big = jax.random.normal(key3, (6000, num_label), dtype=jnp.float32)
    ref_big = _reference_decode(np.asarray(em_big), labels, decoder.ignore)
    for tt in (16384, 2048):
        out = greedy_ctc_decode_packed(em_big, decoder._ignore_ids, tile_t=tt)
        out = np.asarray(jax.device_get(jax.block_until_ready(out)))
        got = _decode_packed(out, labels)
        assert got == ref_big, (tt, got[:80], ref_big[:80])

    print("KERNEL_OK")
</pallas_src>

<mosaic_0001>
module attributes {stable_mosaic.version = 11 : i64} {
  func.func @_greedy_ctc_kernel(%arg0: i32, %arg1: memref<1xi32, #tpu.memory_space<smem>>, %arg2: memref<8x32xf32, #tpu.memory_space<vmem>>, %arg3: memref<1x8xi32, #tpu.memory_space<vmem>>) attributes {dimension_semantics = [#tpu.dimension_semantics<parallel>], iteration_bounds = array<i64: 1>, scalar_prefetch = 1 : i64, scratch_operands = 0 : i64, tpu.core_type = #tpu.core_type<tc>, window_params = [{transform_indices = @transform_0, window_bounds = array<i64: 8, 32>}, {transform_indices = @transform_1, window_bounds = array<i64: 1, 8>}]} {
    %0 = tpu.iota {dimensions = array<i32: 1>} : vector<8x32xi32>
    %1 = arith.sitofp %0 : vector<8x32xi32> to vector<8x32xf32>
    %2 = tpu.iota {dimensions = array<i32: 1>} : vector<8x32xi32>
    %3 = arith.sitofp %2 : vector<8x32xi32> to vector<8x32xf32>
    %4 = tpu.iota {dimensions = array<i32: 1>} : vector<1x8xi32>
    %c-1_i32 = arith.constant -1 : i32
    %5 = vector.broadcast %c-1_i32 : i32 to vector<1x1xi32>
    %c0_i32 = arith.constant 0 : i32
    %c8_i32 = arith.constant 8 : i32
    %6 = arith.muli %c0_i32, %c8_i32 : i32
    %7 = arith.index_cast %6 : i32 to index
    %c0 = arith.constant 0 : index
    %8 = vector.load %arg2[%7, %c0] : memref<8x32xf32, #tpu.memory_space<vmem>>, vector<8x32xf32>
    %cst = arith.constant dense<0xFF800000> : vector<8xf32>
    %9 = vector.multi_reduction <maximumf>, %8, %cst [1] : vector<8x32xf32> to vector<8xf32>
    %10 = vector.shape_cast %9 : vector<8xf32> to vector<8x1xf32>
    %11 = vector.broadcast %10 : vector<8x1xf32> to vector<8x32xf32>
    %12 = arith.cmpf oeq, %8, %11 : vector<8x32xf32>
    %cst_0 = arith.constant 3.200000e+01 : f32
    %13 = vector.broadcast %cst_0 : f32 to vector<8x32xf32>
    %14 = arith.select %12, %1, %13 : vector<8x32xi1>, vector<8x32xf32>
    %cst_1 = arith.constant dense<0x7F800000> : vector<8xf32>
    %15 = vector.multi_reduction <minimumf>, %14, %cst_1 [1] : vector<8x32xf32> to vector<8xf32>
    %16 = vector.shape_cast %15 : vector<8xf32> to vector<8x1xf32>
    %17 = vector.broadcast %16 : vector<8x1xf32> to vector<8x32xf32>
    %18 = arith.cmpf oeq, %1, %17 : vector<8x32xf32>
    %19 = arith.extui %18 : vector<8x32xi1> to vector<8x32xi32>
    %20 = arith.sitofp %19 : vector<8x32xi32> to vector<8x32xf32>
    %cst_2 = arith.constant dense<0.000000e+00> : vector<8x8xf32>
    %21 = tpu.matmul %3, %20, %cst_2 {dimension_numbers = #tpu.dot_dimension_numbers<[1], [1], [0], [0], [0, 0, 1, 0], [], []>} : vector<8x32xf32>, vector<8x32xf32>, vector<8x8xf32> -> vector<8x8xf32>
    %22 = vector.extract_strided_slice %21 {offsets = [0, 0], sizes = [1, 8], strides = [1, 1]} : vector<8x8xf32> to vector<1x8xf32>
    %23 = arith.fptosi %22 : vector<1x8xf32> to vector<1x8xi32>
    %c1_i32 = arith.constant 1 : i32
    %24 = tpu.dynamic_rotate %23 by %c1_i32 dim 1 : vector<1x8xi32>, i32 -> vector<1x8xi32>
    %c0_i32_3 = arith.constant 0 : i32
    %25 = vector.broadcast %c0_i32_3 : i32 to vector<1x8xi32>
    %26 = arith.cmpi eq, %4, %25 : vector<1x8xi32>
    %27 = vector.shape_cast %5 : vector<1x1xi32> to vector<1x1xi32>
    %28 = vector.broadcast %27 : vector<1x1xi32> to vector<1x8xi32>
    %29 = arith.select %26, %28, %24 : vector<1x8xi1>, vector<1x8xi32>
    %30 = arith.cmpi ne, %23, %29 : vector<1x8xi32>
    %false = arith.constant false
    %31 = vector.broadcast %false : i1 to vector<1x8xi1>
    %c0_4 = arith.constant 0 : index
    %32 = memref.load %arg1[%c0_4] : memref<1xi32, #tpu.memory_space<smem>>
    %33 = vector.broadcast %32 : i32 to vector<1x8xi32>
    %34 = arith.cmpi eq, %23, %33 : vector<1x8xi32>
    %35 = arith.ori %31, %34 : vector<1x8xi1>
    %cst_5 = arith.constant dense<true> : vector<1x8xi1>
    %36 = arith.xori %35, %cst_5 : vector<1x8xi1>
    %37 = arith.andi %30, %36 : vector<1x8xi1>
    %38 = arith.extui %37 : vector<1x8xi1> to vector<1x8xi32>
    %c15_i32 = arith.constant 15 : i32
    %39 = vector.broadcast %c15_i32 : i32 to vector<1x8xi32>
    %40 = arith.shli %38, %39 : vector<1x8xi32>
    %41 = arith.ori %40, %23 : vector<1x8xi32>
    %c0_6 = arith.constant 0 : index
    %42 = arith.index_cast %6 : i32 to index
    %43 = vector.load %arg3[%c0_6, %42] : memref<1x8xi32, #tpu.memory_space<vmem>>, vector<1x8xi32>
    tpu.vector_store %arg3[%c0_6, %42], %41 {strides = array<i32>} : memref<1x8xi32, #tpu.memory_space<vmem>>, vector<1x8xi32>,
    %44 = vector.extract_strided_slice %23 {offsets = [0, 7], sizes = [1, 1], strides = [1, 1]} : vector<1x8xi32> to vector<1x1xi32>
    %c1_i32_7 = arith.constant 1 : i32
    return
  }
  func.func @transform_0(%arg0: i32, %arg1: memref<1xi32, #tpu.memory_space<smem>>) -> (i32, i32) {
    %c0_i32 = arith.constant 0 : i32
    %c0_i32_0 = arith.constant 0 : i32
    return %arg0, %c0_i32 : i32, i32
  }
  func.func @transform_1(%arg0: i32, %arg1: memref<1xi32, #tpu.memory_space<smem>>) -> (i32, i32) {
    %c0_i32 = arith.constant 0 : i32
    %c0_i32_0 = arith.constant 0 : i32
    return %c0_i32, %arg0 : i32, i32
  }
}

</mosaic_0001>

<bundles_post_ra>
// kernel: greedy_ctc_decode_packed.1
= control target key start
LH: loop header
LB: loop body
LE: loop exit
PB: predicated region body
PF: predicated region fallthrough
CT: control target
= control target key end

     0   :  { %8 = vsyncpa [#allocation5], 0  ;;  %s275_s0 = inlined_call_operand.<no memory space> [shape: s32[1], index: 0, kind: input, shape index: {}]   ;;  %s276_s1 = inlined_call_operand.hbm [shape: f32[8,32], index: 1, kind: input, shape index: {}]   ;;  %s277_s2 = inlined_call_operand.hbm [shape: s32[1,8], index: 2, kind: output, shape index: {}]  }
   0x1   :  { %9 = vsyncpa [#allocation6], 0  ;;  %s221_s9 = smov [#allocation4]   ;;  %s173_s13 = scalar_lea.hbm %s276_s1, 128 }
   0x2   :  { %s16_s10 = sshll.u32 %s221_s9, 4  ;;  %p174_p0 = scmp.ne.s32.totalorder %s276_s1, %s173_s13  ;;  %s17_s10 = int_to_ptr.vmem [resolvable:$true] %s16_s10 }
   0x3   :  { %p177_p1 = scmp.lt.u32.totalorder %s173_s13, %s276_s1 }
   0x5   :  { %p179_p2 = pnand %p177_p1, %p174_p0 }
   0x7   :  { %182 = shalt.err (!%p179_p2)
}
   0x8   :  { %s183_s18 = scalar_lea.vmem %s17_s10, 128  ;;  %p188_p4 = scmp.lt.s32.totalorder %s17_s10, %s17_s10 }
   0x9   :  { %p184_p3 = scmp.ne.s32.totalorder %s17_s10, %s183_s18  ;;  %p189_p5 = scmp.lt.s32.totalorder %s183_s18, %s183_s18 }
   0xb   :  { %p190_p6 = por %p189_p5, %p188_p4 }
   0xd   :  { %p191_p7 = pnand %p190_p6, %p184_p3 }
   0xf   :  { %194 = shalt.err (!%p191_p7)
}
  0x10   :  { %19 = dma.hbm_to_vmem [thread:$0]  %s276_s1, 128, %s17_s10, [#allocation5]  }
  0x11   :  { %217 = dma.done.wait [#allocation5], 128  }
  0x12   :  { %218 = vsyncadd [#allocation5], 4294967168  ;;  %vm27_vm0 = vcmask 261120   ;;  %v26_v0 = vld [vmem:[#allocation4] sm:$0xff]  ;;  %v222_v2 = vmov 0.0   ;;  %v23_v3 = vlaneseq  ;;  %vm223_vm2 = vmmov 0  }
  0x13   :  { %v28_v1 = vsel %vm27_vm0, %v26_v0, -inf  ;;  %158 = vmatprep.subr.mxu0 %v222_v2  ;;  %160 = vmatprep.mubr.msk.f32.mxu0 %vm223_vm2, %v222_v2  ;;  %s224_s1 = smov 8   ;;  %vm116_vm4 = vcmask 1047616   ;;  %s225_s21 = smov 121   ;;  %v129_v19 = vstv %s275_s0  ;;  %vm226_vm8 = vmmov 1  }
  0x14   :  { %29 = vmax.xlane.f32.xlu0 %v28_v1  ;;  %v24_v4 = vand.u32 127, %v23_v3  ;;  %v227_v22 = vmov 0   ;;  %s228_s24 = smov [#allocation7]   ;;  %vm136_vm11 = vcmask 57344  }
  0x15   :  { %s144_s25 = sshll.u32 %s228_s24, 4  ;;  %s145_s25 = int_to_ptr.vmem [resolvable:$true] %s144_s25 }
  0x16   :  { %v25_v5 = vcvt.s32.f32 %v24_v4  ;;  %vm123_vm5 = vcmp.eq.s32.totalorder %v24_v4, 0  ;;  %s195_s26 = scalar_lea.vmem %s145_s25, 16  ;;  %s199_s0 = scalar_lea.vmem %s145_s25, 32 }
  0x17   :  { %p196_p8 = scmp.ne.s32.totalorder %s145_s25, %s195_s26  ;;  %p200_p9 = scmp.lt.s32.totalorder %s145_s25, %s145_s25 }
  0x18   :  { %p201_p10 = scmp.lt.s32.totalorder %s199_s0, %s195_s26 }
  0x1a   :  { %p202_p11 = por %p201_p10, %p200_p9 }
  0x1c   :  { %p203_p12 = pnand %p202_p11, %p196_p8 }
  0xa1   :  { %v30_v6 = vpop.xlane.xlu0 %29 }
  0xa2   :  { %vm31_vm1 = vcmp.eq.f32.partialorder %v26_v0, %v30_v6 }
  0xa3   :  { %v32_v7 = vsel %vm31_vm1, %v25_v5, 32.0 }
  0xa4   :  { %v33_v8 = vsel %vm27_vm0, %v32_v7, inf }
  0xa5   :  { %34 = vmin.xlane.f32.xlu0 %v33_v8 }
 0x132   :  { %v35_v9 = vpop.xlane.xlu0 %34 }
 0x133   :  { %vm36_vm3 = vcmp.eq.f32.partialorder %v25_v5, %v35_v9 }
 0x134   :  { %v153_v10 = vsel %vm36_vm3, 1.0, %v222_v2 }
 0x135   :  { %159 = vmatpush3.xpose.msk.msra.mxu0 %vm27_vm0, %v153_v10 }
 0x138   :  { %161 = vmatmul.mubr.msk.f32.vlgmr.msra.gmra.mrb[0].mxu0 %vm27_vm0, %v25_v5 }
 0x20b   :  { %v111_v11 = vpop.f32.mrb[0].mxu0 }
 0x20c   :  { %v163_v12 = vtrunc.f32 %v111_v11  ;;  %v162_v13 = vpop.f32.mrb[1].mxu0 }
 0x20e   :  { %v164_v14 = vcvt.f32.s32 %v163_v12 }
 0x210   :  { %117 = vrot.lane.b32.xlu1 %v164_v14, %s224_s1  ;;  %vm130_vm6 = vcmp.eq.s32.totalorder %v164_v14, %v129_v19 }
 0x211   :  { %vm131_vm9 = vmxor %vm130_vm6, %vm226_vm8 }
 0x282   :  { %v118_v15 = vpop.permute.xlu1 %117 }
 0x283   :  { %v119_v16 = vsel %vm116_vm4, %v118_v15, %v164_v14 }
 0x284   :  { %120 = vrot.lane.b32.xlu1 %v119_v16, %s224_s1 }
 0x2f6   :  { %v121_v17 = vpop.permute.xlu1 %120 }
 0x2f7   :  { %v122_v18 = vsel %vm116_vm4, %v121_v17, %v164_v14 }
 0x2f8   :  { %124 = vrot.lane.b32.xlu0 %v122_v18, %s225_s21 }
 0x36a   :  { %v125_v20 = vpop.permute.xlu0 %124 }
 0x36b   :  { %v126_v21 = vsel %vm123_vm5, 4294967295, %v125_v20 }
 0x36c   :  { %vm127_vm7 = vcmp.ne.s32.totalorder %v164_v14, %v126_v21 }
 0x36d   :  { %vm132_vm10 = vmand %vm127_vm7, %vm131_vm9 }
 0x36e   :  { %v133_v23 = vsel %vm132_vm10, 1, %v227_v22 }
 0x36f   :  { %v134_v24 = vshll.u32 %v133_v23, 15 }
 0x371   :  { %v135_v25 = vor.u32 %v164_v14, %v134_v24 }
 0x373   :  { %137 = vst.msk [vmem:[#allocation7] sm:$0x1] %vm136_vm11, %v135_v25 }
 0x374   :  { %206 = shalt.err (!%p203_p12)
}
 0x375   :  { %s207_s29 = scalar_lea.hbm %s277_s2, 16 }
 0x376   :  { %p208_p13 = scmp.ne.s32.totalorder %s277_s2, %s207_s29  ;;  %p211_p0 = scmp.lt.u32.totalorder %s207_s29, %s277_s2 }
 0x378   :  { %p213_p1 = pnand %p211_p0, %p208_p13 }
 0x37a   :  { %216 = shalt.err (!%p213_p1)
}
 0x37b   :  { %147 = dma.vmem_to_hbm [thread:$0]  %s145_s25, 16, %s277_s2, [#allocation6]  }
 0x37c   :  { %219 = dma.done.wait [#allocation6], 16  }
 0x37d   :  { %220 = vsyncadd [#allocation6], 4294967280 }
 0x37e   :  { %151 = vsyncpa [#allocation5], 1 }
 0x37f   :  { %152 = vsyncpa [#allocation6], 1 }

</bundles_post_ra>
